<compile_context>
chip_gen: v7x
topology: tpu7x:2x2x1
jax: 0.10.0
libtpu: 0.0.40
codegen_flags: <defaults>
</compile_context>

<pallas_src>
import functools

import jax
import jax.numpy as jnp
from jax.experimental import pallas as pl
from jax.experimental.pallas import tpu as pltpu

_LANE = 128


def _pick_acc_rows(block_rows):
    """Widest accumulator sublane count that divides the block."""
    for a in (64, 32, 16, 8):
        if block_rows % a == 0:
            return a
    return block_rows  # tiny full-extent block (< 8 rows)


def _l2_partial_kernel(x_ref, t_ref, o_ref, *, acc_rows, valid_rows_last,
                       needs_mask):
    x = x_ref[...].astype(jnp.float32)
    t = t_ref[...].astype(jnp.float32)
    d = x - t
    sq = d * d

    def _fold(v):
        # (block_rows, 128) -> (k, acc_rows, 128) -> sum over k.
        # acc_rows independent accumulator rows => multiple independent
        # vadd chains, so the reduce hides under the block DMA.
        return v.reshape(-1, acc_rows, v.shape[-1]).sum(axis=0)

    if needs_mask:
        # Only the final (ragged) block contains padded garbage rows; gate the
        # iota/compare/select so every other block pays nothing.
        is_last = pl.program_id(0) == pl.num_programs(0) - 1

        @pl.when(is_last)
        def _():
            row_in_block = jax.lax.broadcasted_iota(jnp.int32, sq.shape, 0)
            o_ref[...] = _fold(
                jnp.where(row_in_block < valid_rows_last, sq, 0.0))

        @pl.when(jnp.logical_not(is_last))
        def _():
            o_ref[...] = _fold(sq)
    else:
        o_ref[...] = _fold(sq)


def l2_loss(output, target, div_element=False, target_block_bytes=4 << 20):
    assert output.shape == target.shape
    n_batch = output.shape[0] if output.ndim > 0 else 1
    numel = 1
    for d in output.shape:
        numel *= d

    x = output.reshape(-1)
    t = target.reshape(-1)

    rows = numel // _LANE
    main = rows * _LANE

    tail_sum = jnp.float32(0.0)
    if main < numel:
        # Rare path (numel % 128 != 0): reduce the <128-element tail in plain
        # JAX.  (The prefix slice below does materialize a copy, but only in
        # this lane-unaligned case.)
        xt = x[main:].astype(jnp.float32)
        tt = t[main:].astype(jnp.float32)
        tail_sum = jnp.sum((xt - tt) ** 2)

    if rows == 0:
        total = tail_sum
    else:
        if main < numel:
            x2 = x[:main].reshape(rows, _LANE)
            t2 = t[:main].reshape(rows, _LANE)
        else:
            # Contiguous metadata-only reshape: no HBM copy.
            x2 = x.reshape(rows, _LANE)
            t2 = t.reshape(rows, _LANE)

        itemsize = jnp.dtype(output.dtype).itemsize
        # Size the block by bytes so each input DMA stays ~4 MiB regardless of
        # dtype (8192 rows f32, 16384 rows bf16, ...), rounded to a multiple
        # of 64 sublanes for the fold accumulator.
        max_br = max(64, (target_block_bytes // (_LANE * itemsize)) // 64 * 64)
        if rows >= 8:
            # At least two roughly balanced blocks so the "parallel" grid axis
            # keeps both v7x TensorCores busy; harmless on v5e/v6e.
            half = -(-rows // 2)          # cdiv(rows, 2)
            half8 = -(-half // 8) * 8     # round up to a sublane multiple
            br = min(max_br, half8)       # always <= rows when rows >= 8
        else:
            br = rows                     # tiny input: full-extent block
        grid = -(-rows // br)
        acc_rows = _pick_acc_rows(br)
        needs_mask = (rows % br) != 0
        valid_rows_last = rows - (grid - 1) * br

        kernel = functools.partial(
            _l2_partial_kernel,
            acc_rows=acc_rows,
            valid_rows_last=valid_rows_last,
            needs_mask=needs_mask,
        )

        cost = pl.CostEstimate(
            flops=3 * rows * _LANE,  # sub + mul + add per element
            transcendentals=0,
            bytes_accessed=2 * rows * _LANE * itemsize
            + grid * acc_rows * _LANE * 4,
        )

        partials = pl.pallas_call(
            kernel,
            out_shape=jax.ShapeDtypeStruct((grid, acc_rows, _LANE),
                                           jnp.float32),
            grid_spec=pltpu.PrefetchScalarGridSpec(
                num_scalar_prefetch=0,
                grid=(grid,),
                in_specs=[
                    pl.BlockSpec((br, _LANE), lambda i: (i, 0)),
                    pl.BlockSpec((br, _LANE), lambda i: (i, 0)),
                ],
                out_specs=pl.BlockSpec((None, acc_rows, _LANE),
                                       lambda i: (i, 0, 0)),
            ),
            compiler_params=pltpu.CompilerParams(
                dimension_semantics=("parallel",),
                # 16 MiB of double-buffered input + tiny partials; 32 MiB is
                # legal on v5e/v6e (128 MiB physical) and leaves half of
                # v7x's 64 MiB physical VMEM as headroom.
                vmem_limit_bytes=32 << 20,
            ),
            cost_estimate=cost,
        )(x2, t2)

        total = jnp.sum(partials) + tail_sum

    # Exact divisor computed in Python, applied once at the end.
    # TODO(synk): numel == 0 / batch == 0 would be a div-by-zero in PyTorch;
    # here we just return 0 for that degenerate case.
    if div_element:
        scale = 1.0 / float(numel) if numel else 0.0
    else:
        scale = 1.0 / (float(n_batch) * 2.0) if n_batch else 0.0
    return total * jnp.float32(scale)


def l2_loss_ref(output, target, div_element=False):
    x = output.astype(jnp.float32)
    t = target.astype(jnp.float32)
    loss = jnp.sum((x - t) ** 2)
    if div_element:
        return loss / output.size
    return loss / output.shape[0] / 2.0


if __name__ == "__main__":
    key = jax.random.PRNGKey(0)
    k1, k2, k3, k4, k5, k6 = jax.random.split(key, 6)

    l2 = jax.jit(l2_loss, static_argnames=("div_element",))

    # 1) Small NCHW-like shape (2048 elems -> 16 rows, 2 grid blocks, no mask).
    out = jax.random.uniform(k1, (2, 4, 16, 16), dtype=jnp.float32)
    tgt = jax.random.uniform(k2, (2, 4, 16, 16), dtype=jnp.float32)
    loss = jax.block_until_ready(l2(out, tgt, div_element=False))
    ref = l2_loss_ref(out, tgt, div_element=False)
    assert jnp.allclose(loss, ref, rtol=1e-5, atol=1e-5), (loss, ref)

    loss_e = jax.block_until_ready(l2(out, tgt, div_element=True))
    ref_e = l2_loss_ref(out, tgt, div_element=True)
    assert jnp.allclose(loss_e, ref_e, rtol=1e-5, atol=1e-6), (loss_e, ref_e)

    # 2) Ragged last block (3072 elems -> 24 rows, block 16 -> masked tail).
    out2 = jax.random.normal(k3, (3, 4, 16, 16), dtype=jnp.float32)
    tgt2 = jax.random.normal(k4, (3, 4, 16, 16), dtype=jnp.float32)
    loss2 = jax.block_until_ready(l2(out2, tgt2, div_element=False))
    ref2 = l2_loss_ref(out2, tgt2, div_element=False)
    assert jnp.allclose(loss2, ref2, rtol=1e-5, atol=1e-5), (loss2, ref2)

    # 3) Lane-unaligned numel (770 elems -> 6 rows + 2-element JAX tail).
    out3 = jax.random.normal(k5, (2, 5, 7, 11), dtype=jnp.float32)
    tgt3 = jax.random.normal(k6, (2, 5, 7, 11), dtype=jnp.float32)
    loss3 = jax.block_until_ready(l2(out3, tgt3, div_element=True))
    ref3 = l2_loss_ref(out3, tgt3, div_element=True)
    assert jnp.allclose(loss3, ref3, rtol=1e-5, atol=1e-6), (loss3, ref3)

    print("KERNEL_OK")
</pallas_src>

<mosaic_0001>
module attributes {stable_mosaic.version = 11 : i64} {
  func.func @_l2_partial_kernel(%arg0: i32, %arg1: memref<8x128xf32, #tpu.memory_space<vmem>>, %arg2: memref<8x128xf32, #tpu.memory_space<vmem>>, %arg3: memref<1x8x128xf32, #tpu.memory_space<vmem>>) attributes {dimension_semantics = [#tpu.dimension_semantics<parallel>], iteration_bounds = array<i64: 2>, scalar_prefetch = 0 : i64, scratch_operands = 0 : i64, tpu.core_type = #tpu.core_type<tc>, window_params = [{transform_indices = @transform_0, window_bounds = array<i64: 8, 128>}, {transform_indices = @transform_1, window_bounds = array<i64: 8, 128>}, {transform_indices = @transform_2, window_bounds = array<i64: 1, 8, 128>}]} {
    %c0 = arith.constant 0 : index
    %c0_0 = arith.constant 0 : index
    %0 = vector.load %arg1[%c0, %c0_0] : memref<8x128xf32, #tpu.memory_space<vmem>>, vector<8x128xf32>
    %c0_1 = arith.constant 0 : index
    %c0_2 = arith.constant 0 : index
    %1 = vector.load %arg2[%c0_1, %c0_2] : memref<8x128xf32, #tpu.memory_space<vmem>>, vector<8x128xf32>
    %2 = arith.subf %0, %1 : vector<8x128xf32>
    %3 = arith.mulf %2, %2 : vector<8x128xf32>
    %4 = vector.shape_cast %3 : vector<8x128xf32> to vector<1x8x128xf32>
    %cst = arith.constant dense<0.000000e+00> : vector<8x128xf32>
    %5 = vector.multi_reduction <add>, %4, %cst [0] : vector<1x8x128xf32> to vector<8x128xf32>
    %c0_3 = arith.constant 0 : index
    %c0_4 = arith.constant 0 : index
    %c0_5 = arith.constant 0 : index
    %6 = vector.load %arg3[%c0_3, %c0_4, %c0_5] : memref<1x8x128xf32, #tpu.memory_space<vmem>>, vector<1x8x128xf32>
    %7 = vector.shape_cast %6 : vector<1x8x128xf32> to vector<8x128xf32>
    %8 = vector.shape_cast %5 : vector<8x128xf32> to vector<1x8x128xf32>
    tpu.vector_store %arg3[%c0_3, %c0_4, %c0_5], %8 {strides = array<i32>} : memref<1x8x128xf32, #tpu.memory_space<vmem>>, vector<1x8x128xf32>,
    return
  }
  func.func @transform_0(%arg0: i32) -> (i32, i32) {
    %c0_i32 = arith.constant 0 : i32
    %c0_i32_0 = arith.constant 0 : i32
    return %arg0, %c0_i32 : i32, i32
  }
  func.func @transform_1(%arg0: i32) -> (i32, i32) {
    %c0_i32 = arith.constant 0 : i32
    %c0_i32_0 = arith.constant 0 : i32
    return %arg0, %c0_i32 : i32, i32
  }
  func.func @transform_2(%arg0: i32) -> (i32, i32, i32) {
    %c0_i32 = arith.constant 0 : i32
    %c0_i32_0 = arith.constant 0 : i32
    %c0_i32_1 = arith.constant 0 : i32
    return %arg0, %c0_i32, %c0_i32_0 : i32, i32, i32
  }
}

</mosaic_0001>

<bundles_post_ra>
// kernel: l2_loss.1
= control target key start
LH: loop header
LB: loop body
LE: loop exit
PB: predicated region body
PF: predicated region fallthrough
CT: control target
= control target key end

     0   :  { %s249_s9 = smov 0   ;;  %s277_s0 = inlined_call_operand.vmem [shape: f32[16,128], index: 0, kind: input, shape index: {}]   ;;  %s278_s1 = inlined_call_operand.vmem [shape: f32[16,128], index: 1, kind: input, shape index: {}]   ;;  %s279_s2 = inlined_call_operand.vmem [shape: f32[2,8,128], index: 2, kind: output, shape index: {}]  }
   0x1 LB: > { %s227_s10 = sadd.s32 4294967295, %s251_s9   ;;  %p231_p0 = scmp.ge.s32.totalorder %s251_s9, 1  ;;  %s251_s9 = sphi %s249_s9, %s12_s9  }
   0x2   : > { %p120_p1 = scmp.lt.s32.totalorder %s251_s9, 3 }
   0x4   : > { %p121_p2 = pnand %p231_p0, %p120_p1 }
   0x5   : > { %p144_p3 = scmp.lt.s32.totalorder (!%p121_p2), %s227_s10, 1 }
   0x6   : > { %124 = sbr.rel (%p121_p2) target bundleno = 23 (0x17), region = 28 }
   0xd   : > { %s281_s10 = smov (!%p144_p3, %s227_s10), 1 }
   0xe   : > { %s232_s11 = sshll.u32 %s281_s10, 3 }
   0xf   : > { %s147_s14 = scalar_lea.vmem %s277_s0, %s232_s11  ;;  %s151_s17 = scalar_lea.vmem %s278_s1, %s232_s11 }
  0x10   : > { %v156_v0 = vld [vmem:[%s147_s14] sm:$0xff]  ;;  %s155_s20 = scalar_lea.vmem %s279_s2, %s232_s11 }
  0x11   : > { %v157_v1 = vld [vmem:[%s151_s17] sm:$0xff] }
  0x12   : > { %v158_v2 = vsub.f32 %v156_v0, %v157_v1 }
  0x14   : > { %v159_v3 = vmul.f32 %v158_v2, %v158_v2 }
  0x16   : > { %161 = vst [vmem:[%s155_s20] sm:$0xff] %v159_v3 }
  0x17 PF: > { %s12_s9 = sadd.s32 1, %s251_s9  }
  0x18   : > { %p9_p4 = scmp.ge.s32.totalorder %s12_s9, 4  }
  0x1a   :  { %11 = sbr.rel (!%p9_p4) target bundleno = 1 (0x1), region = 61 }

</bundles_post_ra>
